<compile_context>
chip_gen: v5e
topology: v5e:2x2
jax: 0.10.0
libtpu: 0.0.40
codegen_flags: <defaults>
</compile_context>

<pallas_src>
import functools

import jax
import jax.numpy as jnp
from jax.experimental import pallas as pl
from jax.experimental.pallas import tpu as pltpu

INPUT_SIZE = 128
HIDDEN = 100
N_CLASSES = 2
BN_EPS = 1e-5

HP = 128   # hidden features padded to a full 128-lane group (100 -> 128)
CP = 128   # class logits padded to 128 lanes for the fc2 MXU matmul


def _round_up(n, m):
    return ((n + m - 1) // m) * m


# --------------------- phase 1: fc1 (no bias) + BN partial stats ------------
def _phase1_kernel(n_valid, x_ref, w1_ref, psum_ref, psq_ref):
    i = pl.program_id(0)
    tb = x_ref.shape[0]

    # hc = x @ W1 (bias-free: the fc1 bias cancels inside train-mode BatchNorm
    # and leaving it out acts as a shifted sum-of-squares anchor).
    hc = jnp.dot(x_ref[...], w1_ref[...], preferred_element_type=jnp.float32)

    # Zero out rows past the real batch.  The ragged last tile reads
    # unspecified data; jnp.where (a select) keeps the reduction NaN-safe.
    row = jax.lax.broadcasted_iota(jnp.int32, (tb, 1), 0) + i * tb
    hm = jnp.where(row < n_valid, hc, 0.0)

    # Batch reduction as a (1,tb)x(tb,HP) MXU matmul (no cross-sublane XLU chain).
    ones_row = jnp.ones((1, tb), jnp.float32)
    psum_ref[...] = jnp.dot(ones_row, hm,
                            preferred_element_type=jnp.float32).reshape(1, 1, HP)
    psq_ref[...] = jnp.dot(ones_row, hm * hm,
                           preferred_element_type=jnp.float32).reshape(1, 1, HP)


# ---------- phase 2: fc1 recompute + BN affine + ReLU + fc2 + log-softmax ---
def _phase2_kernel(x_ref, w1_ref, scale_ref, shift_ref, w2_ref, b2_ref, o_ref):
    hc = jnp.dot(x_ref[...], w1_ref[...], preferred_element_type=jnp.float32)
    a = jnp.maximum(hc * scale_ref[...] + shift_ref[...], 0.0)
    # fc2 as a lane-dense (tb,128)x(128,128) MXU matmul; padded class columns
    # carry zero weights and a -1e30 bias so exp() underflows to 0 in the LSE.
    # NOTE: the -1e30 trick requires f32 logits (preferred_element_type below).
    logits = jnp.dot(a, w2_ref[...],
                     preferred_element_type=jnp.float32) + b2_ref[...]
    m = jnp.max(logits, axis=-1, keepdims=True)
    shifted = logits - m
    lse = jnp.log(jnp.sum(jnp.exp(shifted), axis=-1, keepdims=True))
    # Narrow HBM writeback: only the 2 real class lanes leave the kernel.
    o_ref[...] = (shifted - lse)[:, :N_CLASSES]


@functools.partial(jax.jit, static_argnames=("tile_b",))
def dann_forward(x, params, *, tile_b=2048):
    """Forward pass matching DANN.domain_classifier in training mode."""
    w1, b1, gamma, beta, w2, b2 = params
    del b1  # fc1 bias cancels exactly inside train-mode BatchNorm.
    B, D = x.shape
    f32 = jnp.float32

    DP = _round_up(D, 128)
    # x is consumed as-is (zero wrapper copies) when the feature dim is already
    # lane-dense (INPUT_SIZE == 128).  Only pad features for other input sizes.
    x_in = x if D == DP else jnp.pad(x, ((0, 0), (0, DP - D)))

    tb = min(_round_up(int(tile_b), 8), _round_up(B, 8))
    nt = (B + tb - 1) // tb

    # ---- tiny one-time weight padding (zero weights => exact results) ------
    w1_p = jnp.zeros((DP, HP), f32).at[:D, :HIDDEN].set(w1).astype(x_in.dtype)
    gamma_p = jnp.zeros((1, HP), f32).at[:, :HIDDEN].set(gamma)
    beta_p = jnp.zeros((1, HP), f32).at[:, :HIDDEN].set(beta)
    w2_p = jnp.zeros((HP, CP), f32).at[:HIDDEN, :N_CLASSES].set(w2)
    b2_p = jnp.full((1, CP), -1e30, f32).at[:, :N_CLASSES].set(b2)

    # ------------------------------ phase 1 --------------------------------
    # Per-tile partial sum / sum-of-squares of hc = x @ W1 (batch stays
    # "parallel": each grid step owns its own (1,1,HP) stat slab).
    psum, psq = pl.pallas_call(
        functools.partial(_phase1_kernel, B),
        out_shape=(jax.ShapeDtypeStruct((nt, 1, HP), f32),
                   jax.ShapeDtypeStruct((nt, 1, HP), f32)),
        grid_spec=pltpu.PrefetchScalarGridSpec(
            num_scalar_prefetch=0,
            grid=(nt,),
            in_specs=[
                pl.BlockSpec((tb, DP), lambda i: (i, 0)),    # x tile (stream)
                pl.BlockSpec((DP, HP), lambda i: (0, 0)),    # W1 (VMEM-resident)
            ],
            out_specs=(
                pl.BlockSpec((1, 1, HP), lambda i: (i, 0, 0)),  # partial sum
                pl.BlockSpec((1, 1, HP), lambda i: (i, 0, 0)),  # partial sumsq
            )),
        compiler_params=pltpu.CompilerParams(
            dimension_semantics=("parallel",)),
    )(x_in, w1_p)

    # ---- tiny (1,128) glue math: fold whole-batch BN stats into scale/shift
    s = jnp.sum(psum, axis=0)            # (1, HP)
    sq = jnp.sum(psq, axis=0)            # (1, HP)
    mean_c = s / B
    var = jnp.maximum(sq / B - mean_c * mean_c, 0.0)   # biased variance
    inv_std = jax.lax.rsqrt(var + BN_EPS)
    scale = gamma_p * inv_std
    shift = beta_p - mean_c * scale      # (fc1 bias already cancelled)

    # ------------------------------ phase 2 --------------------------------
    out = pl.pallas_call(
        _phase2_kernel,
        out_shape=jax.ShapeDtypeStruct((B, N_CLASSES), f32),
        grid_spec=pltpu.PrefetchScalarGridSpec(
            num_scalar_prefetch=0,
            grid=(nt,),
            in_specs=[
                pl.BlockSpec((tb, DP), lambda i: (i, 0)),    # x tile (stream)
                pl.BlockSpec((DP, HP), lambda i: (0, 0)),    # W1 (resident)
                pl.BlockSpec((1, HP), lambda i: (0, 0)),     # BN scale (resident)
                pl.BlockSpec((1, HP), lambda i: (0, 0)),     # BN shift (resident)
                pl.BlockSpec((HP, CP), lambda i: (0, 0)),    # W2 (resident)
                pl.BlockSpec((1, CP), lambda i: (0, 0)),     # b2 (resident)
            ],
            out_specs=pl.BlockSpec((tb, N_CLASSES), lambda i: (i, 0))),
        compiler_params=pltpu.CompilerParams(
            dimension_semantics=("parallel",)),
    )(x_in, w1_p, scale, shift, w2_p, b2_p)

    return out


def init_params(key):
    """PyTorch-like init: Linear uniform(-1/sqrt(fan_in), +), BN gamma=1/beta=0.
    Linear weights stored transposed as (in_features, out_features)."""
    k1, k2, k3, k4 = jax.random.split(key, 4)
    bound1 = 1.0 / jnp.sqrt(float(INPUT_SIZE))
    w1 = jax.random.uniform(k1, (INPUT_SIZE, HIDDEN), jnp.float32, -bound1, bound1)
    b1 = jax.random.uniform(k2, (1, HIDDEN), jnp.float32, -bound1, bound1)
    gamma = jnp.ones((1, HIDDEN), jnp.float32)
    beta = jnp.zeros((1, HIDDEN), jnp.float32)
    bound2 = 1.0 / jnp.sqrt(float(HIDDEN))
    w2 = jax.random.uniform(k3, (HIDDEN, N_CLASSES), jnp.float32, -bound2, bound2)
    b2 = jax.random.uniform(k4, (1, N_CLASSES), jnp.float32, -bound2, bound2)
    return (w1, b1, gamma, beta, w2, b2)


def reference_forward(x, params):
    """Pure-JAX reference (BatchNorm1d in training mode, biased variance)."""
    w1, b1, gamma, beta, w2, b2 = params
    h = x @ w1 + b1
    mean = jnp.mean(h, axis=0, keepdims=True)
    var = jnp.mean((h - mean) ** 2, axis=0, keepdims=True)
    h = (h - mean) / jnp.sqrt(var + BN_EPS) * gamma + beta
    h = jnp.maximum(h, 0.0)
    logits = h @ w2 + b2
    return jax.nn.log_softmax(logits, axis=1)


if __name__ == "__main__":
    key = jax.random.PRNGKey(0)
    k_params, k_x1, k_x2, k_x3 = jax.random.split(key, 4)
    params = init_params(k_params)

    # Small batch (single tile), matching typical DANN demo usage.
    x_small = jax.random.normal(k_x1, (8, INPUT_SIZE), jnp.float32)
    out_small = jax.block_until_ready(dann_forward(x_small, params))
    ref_small = reference_forward(x_small, params)
    assert out_small.shape == (8, N_CLASSES)
    err_s = float(jnp.max(jnp.abs(out_small - ref_small)))
    assert jnp.allclose(out_small, ref_small, atol=1e-3, rtol=1e-3), (
        f"small-batch mismatch: max abs err {err_s}")

    # Multi-tile + ragged last tile (B not a multiple of the tile or of 8),
    # exercising the in-kernel masking of the whole-batch BN statistics and
    # the dropped out-of-bounds output rows.
    x_big = jax.random.normal(k_x2, (300, INPUT_SIZE), jnp.float32)
    out_big = jax.block_until_ready(dann_forward(x_big, params, tile_b=128))
    ref_big = reference_forward(x_big, params)
    assert out_big.shape == (300, N_CLASSES)
    err_b = float(jnp.max(jnp.abs(out_big - ref_big)))
    assert jnp.allclose(out_big, ref_big, atol=1e-3, rtol=1e-3), (
        f"multi-tile mismatch: max abs err {err_b}")

    # Tiny batch (< 8 rows): single ragged tile end to end.
    x_tiny = jax.random.normal(k_x3, (5, INPUT_SIZE), jnp.float32)
    out_tiny = jax.block_until_ready(dann_forward(x_tiny, params))
    ref_tiny = reference_forward(x_tiny, params)
    assert out_tiny.shape == (5, N_CLASSES)
    err_t = float(jnp.max(jnp.abs(out_tiny - ref_tiny)))
    assert jnp.allclose(out_tiny, ref_tiny, atol=1e-3, rtol=1e-3), (
        f"tiny-batch mismatch: max abs err {err_t}")

    print("KERNEL_OK")
</pallas_src>

<mosaic_0001>
module attributes {stable_mosaic.version = 11 : i64} {
  func.func @_phase1_kernel(%arg0: i32, %arg1: memref<8x128xf32, #tpu.memory_space<vmem>>, %arg2: memref<128x128xf32, #tpu.memory_space<vmem>>, %arg3: memref<1x1x128xf32, #tpu.memory_space<vmem>>, %arg4: memref<1x1x128xf32, #tpu.memory_space<vmem>>) attributes {dimension_semantics = [#tpu.dimension_semantics<parallel>], iteration_bounds = array<i64: 1>, scalar_prefetch = 0 : i64, scratch_operands = 0 : i64, tpu.core_type = #tpu.core_type<tc>, window_params = [{transform_indices = @transform_0, window_bounds = array<i64: 8, 128>}, {pipeline_mode = #tpu.pipeline_mode<synchronous>, transform_indices = @transform_1, window_bounds = array<i64: 128, 128>}, {transform_indices = @transform_2, window_bounds = array<i64: 1, 1, 128>}, {transform_indices = @transform_3, window_bounds = array<i64: 1, 1, 128>}]} {
    %c0 = arith.constant 0 : index
    %c0_0 = arith.constant 0 : index
    %0 = vector.load %arg1[%c0, %c0_0] : memref<8x128xf32, #tpu.memory_space<vmem>>, vector<8x128xf32>
    %c0_1 = arith.constant 0 : index
    %c0_2 = arith.constant 0 : index
    %1 = vector.load %arg2[%c0_1, %c0_2] : memref<128x128xf32, #tpu.memory_space<vmem>>, vector<128x128xf32>
    %cst = arith.constant dense<0.000000e+00> : vector<8x128xf32>
    %2 = tpu.matmul %0, %1, %cst {dimension_numbers = #tpu.dot_dimension_numbers<[1], [0], [0], [1], [0, 0, 1, 1], [], []>} : vector<8x128xf32>, vector<128x128xf32>, vector<8x128xf32> -> vector<8x128xf32>
    %3 = tpu.iota {dimensions = array<i32: 0>} : vector<8x1xi32>
    %c8_i32 = arith.constant 8 : i32
    %4 = arith.muli %arg0, %c8_i32 : i32
    %5 = vector.broadcast %4 : i32 to vector<8x1xi32>
    %6 = arith.addi %3, %5 : vector<8x1xi32>
    %c8_i32_3 = arith.constant 8 : i32
    %7 = vector.broadcast %c8_i32_3 : i32 to vector<8x1xi32>
    %8 = arith.cmpi slt, %6, %7 : vector<8x1xi32>
    %cst_4 = arith.constant 0.000000e+00 : f32
    %9 = vector.shape_cast %8 : vector<8x1xi1> to vector<8x1xi1>
    %10 = vector.broadcast %9 : vector<8x1xi1> to vector<8x128xi1>
    %11 = vector.broadcast %cst_4 : f32 to vector<8x128xf32>
    %12 = arith.select %10, %2, %11 : vector<8x128xi1>, vector<8x128xf32>
    %cst_5 = arith.constant 1.000000e+00 : f32
    %13 = vector.broadcast %cst_5 : f32 to vector<1x8xf32>
    %cst_6 = arith.constant dense<0.000000e+00> : vector<1x128xf32>
    %14 = tpu.matmul %13, %12, %cst_6 {dimension_numbers = #tpu.dot_dimension_numbers<[1], [0], [0], [1], [0, 0, 1, 1], [], []>} : vector<1x8xf32>, vector<8x128xf32>, vector<1x128xf32> -> vector<1x128xf32>
    %15 = vector.shape_cast %14 : vector<1x128xf32> to vector<1x1x128xf32>
    %c0_7 = arith.constant 0 : index
    %c0_8 = arith.constant 0 : index
    %c0_9 = arith.constant 0 : index
    %16 = vector.load %arg3[%c0_7, %c0_8, %c0_9] : memref<1x1x128xf32, #tpu.memory_space<vmem>>, vector<1x1x128xf32>
    tpu.vector_store %arg3[%c0_7, %c0_8, %c0_9], %15 {strides = array<i32>} : memref<1x1x128xf32, #tpu.memory_space<vmem>>, vector<1x1x128xf32>,
    %17 = arith.mulf %12, %12 : vector<8x128xf32>
    %cst_10 = arith.constant dense<0.000000e+00> : vector<1x128xf32>
    %18 = tpu.matmul %13, %17, %cst_10 {dimension_numbers = #tpu.dot_dimension_numbers<[1], [0], [0], [1], [0, 0, 1, 1], [], []>} : vector<1x8xf32>, vector<8x128xf32>, vector<1x128xf32> -> vector<1x128xf32>
    %19 = vector.shape_cast %18 : vector<1x128xf32> to vector<1x1x128xf32>
    %c0_11 = arith.constant 0 : index
    %c0_12 = arith.constant 0 : index
    %c0_13 = arith.constant 0 : index
    %20 = vector.load %arg4[%c0_11, %c0_12, %c0_13] : memref<1x1x128xf32, #tpu.memory_space<vmem>>, vector<1x1x128xf32>
    tpu.vector_store %arg4[%c0_11, %c0_12, %c0_13], %19 {strides = array<i32>} : memref<1x1x128xf32, #tpu.memory_space<vmem>>, vector<1x1x128xf32>,
    return
  }
  func.func @transform_0(%arg0: i32) -> (i32, i32) {
    %c0_i32 = arith.constant 0 : i32
    %c0_i32_0 = arith.constant 0 : i32
    return %arg0, %c0_i32 : i32, i32
  }
  func.func @transform_1(%arg0: i32) -> (i32, i32) {
    %c0_i32 = arith.constant 0 : i32
    %c0_i32_0 = arith.constant 0 : i32
    %c0_i32_1 = arith.constant 0 : i32
    return %c0_i32, %c0_i32_0 : i32, i32
  }
  func.func @transform_2(%arg0: i32) -> (i32, i32, i32) {
    %c0_i32 = arith.constant 0 : i32
    %c0_i32_0 = arith.constant 0 : i32
    %c0_i32_1 = arith.constant 0 : i32
    return %arg0, %c0_i32, %c0_i32_0 : i32, i32, i32
  }
  func.func @transform_3(%arg0: i32) -> (i32, i32, i32) {
    %c0_i32 = arith.constant 0 : i32
    %c0_i32_0 = arith.constant 0 : i32
    %c0_i32_1 = arith.constant 0 : i32
    return %arg0, %c0_i32, %c0_i32_0 : i32, i32, i32
  }
}

module attributes {stable_mosaic.version = 11 : i64} {
  func.func @_phase2_kernel(%arg0: i32, %arg1: memref<8x128xf32, #tpu.memory_space<vmem>>, %arg2: memref<128x128xf32, #tpu.memory_space<vmem>>, %arg3: memref<1x128xf32, #tpu.memory_space<vmem>>, %arg4: memref<1x128xf32, #tpu.memory_space<vmem>>, %arg5: memref<128x128xf32, #tpu.memory_space<vmem>>, %arg6: memref<1x128xf32, #tpu.memory_space<vmem>>, %arg7: memref<8x2xf32, #tpu.memory_space<vmem>>) attributes {dimension_semantics = [#tpu.dimension_semantics<parallel>], iteration_bounds = array<i64: 1>, scalar_prefetch = 0 : i64, scratch_operands = 0 : i64, tpu.core_type = #tpu.core_type<tc>, window_params = [{transform_indices = @transform_0, window_bounds = array<i64: 8, 128>}, {pipeline_mode = #tpu.pipeline_mode<synchronous>, transform_indices = @transform_1, window_bounds = array<i64: 128, 128>}, {pipeline_mode = #tpu.pipeline_mode<synchronous>, transform_indices = @transform_2, window_bounds = array<i64: 1, 128>}, {pipeline_mode = #tpu.pipeline_mode<synchronous>, transform_indices = @transform_3, window_bounds = array<i64: 1, 128>}, {pipeline_mode = #tpu.pipeline_mode<synchronous>, transform_indices = @transform_4, window_bounds = array<i64: 128, 128>}, {pipeline_mode = #tpu.pipeline_mode<synchronous>, transform_indices = @transform_5, window_bounds = array<i64: 1, 128>}, {transform_indices = @transform_6, window_bounds = array<i64: 8, 2>}]} {
    %c0 = arith.constant 0 : index
    %c0_0 = arith.constant 0 : index
    %0 = vector.load %arg1[%c0, %c0_0] : memref<8x128xf32, #tpu.memory_space<vmem>>, vector<8x128xf32>
    %c0_1 = arith.constant 0 : index
    %c0_2 = arith.constant 0 : index
    %1 = vector.load %arg2[%c0_1, %c0_2] : memref<128x128xf32, #tpu.memory_space<vmem>>, vector<128x128xf32>
    %cst = arith.constant dense<0.000000e+00> : vector<8x128xf32>
    %2 = tpu.matmul %0, %1, %cst {dimension_numbers = #tpu.dot_dimension_numbers<[1], [0], [0], [1], [0, 0, 1, 1], [], []>} : vector<8x128xf32>, vector<128x128xf32>, vector<8x128xf32> -> vector<8x128xf32>
    %c0_3 = arith.constant 0 : index
    %c0_4 = arith.constant 0 : index
    %3 = vector.load %arg3[%c0_3, %c0_4] : memref<1x128xf32, #tpu.memory_space<vmem>>, vector<1x128xf32>
    %4 = vector.broadcast %3 : vector<1x128xf32> to vector<8x128xf32>
    %5 = arith.mulf %2, %4 : vector<8x128xf32>
    %c0_5 = arith.constant 0 : index
    %c0_6 = arith.constant 0 : index
    %6 = vector.load %arg4[%c0_5, %c0_6] : memref<1x128xf32, #tpu.memory_space<vmem>>, vector<1x128xf32>
    %7 = vector.broadcast %6 : vector<1x128xf32> to vector<8x128xf32>
    %8 = arith.addf %5, %7 : vector<8x128xf32>
    %cst_7 = arith.constant 0.000000e+00 : f32
    %9 = vector.broadcast %cst_7 : f32 to vector<8x128xf32>
    %10 = arith.maximumf %8, %9 : vector<8x128xf32>
    %c0_8 = arith.constant 0 : index
    %c0_9 = arith.constant 0 : index
    %11 = vector.load %arg5[%c0_8, %c0_9] : memref<128x128xf32, #tpu.memory_space<vmem>>, vector<128x128xf32>
    %cst_10 = arith.constant dense<0.000000e+00> : vector<8x128xf32>
    %12 = tpu.matmul %10, %11, %cst_10 {dimension_numbers = #tpu.dot_dimension_numbers<[1], [0], [0], [1], [0, 0, 1, 1], [], []>} : vector<8x128xf32>, vector<128x128xf32>, vector<8x128xf32> -> vector<8x128xf32>
    %c0_11 = arith.constant 0 : index
    %c0_12 = arith.constant 0 : index
    %13 = vector.load %arg6[%c0_11, %c0_12] : memref<1x128xf32, #tpu.memory_space<vmem>>, vector<1x128xf32>
    %14 = vector.broadcast %13 : vector<1x128xf32> to vector<8x128xf32>
    %15 = arith.addf %12, %14 : vector<8x128xf32>
    %cst_13 = arith.constant dense<0xFF800000> : vector<8xf32>
    %16 = vector.multi_reduction <maximumf>, %15, %cst_13 [1] : vector<8x128xf32> to vector<8xf32>
    %17 = vector.shape_cast %16 : vector<8xf32> to vector<8x1xf32>
    %18 = vector.broadcast %17 : vector<8x1xf32> to vector<8x128xf32>
    %19 = arith.subf %15, %18 : vector<8x128xf32>
    %20 = math.exp %19 : vector<8x128xf32>
    %cst_14 = arith.constant dense<0.000000e+00> : vector<8xf32>
    %21 = vector.multi_reduction <add>, %20, %cst_14 [1] : vector<8x128xf32> to vector<8xf32>
    %22 = vector.shape_cast %21 : vector<8xf32> to vector<8x1xf32>
    %23 = math.log %22 : vector<8x1xf32>
    %24 = vector.broadcast %23 : vector<8x1xf32> to vector<8x128xf32>
    %25 = arith.subf %19, %24 : vector<8x128xf32>
    %26 = vector.extract_strided_slice %25 {offsets = [0, 0], sizes = [8, 2], strides = [1, 1]} : vector<8x128xf32> to vector<8x2xf32>
    %c0_15 = arith.constant 0 : index
    %c0_16 = arith.constant 0 : index
    %27 = vector.load %arg7[%c0_15, %c0_16] : memref<8x2xf32, #tpu.memory_space<vmem>>, vector<8x2xf32>
    tpu.vector_store %arg7[%c0_15, %c0_16], %26 {strides = array<i32>} : memref<8x2xf32, #tpu.memory_space<vmem>>, vector<8x2xf32>,
    return
  }
  func.func @transform_0(%arg0: i32) -> (i32, i32) {
    %c0_i32 = arith.constant 0 : i32
    %c0_i32_0 = arith.constant 0 : i32
    return %arg0, %c0_i32 : i32, i32
  }
  func.func @transform_1(%arg0: i32) -> (i32, i32) {
    %c0_i32 = arith.constant 0 : i32
    %c0_i32_0 = arith.constant 0 : i32
    %c0_i32_1 = arith.constant 0 : i32
    return %c0_i32, %c0_i32_0 : i32, i32
  }
  func.func @transform_2(%arg0: i32) -> (i32, i32) {
    %c0_i32 = arith.constant 0 : i32
    %c0_i32_0 = arith.constant 0 : i32
    %c0_i32_1 = arith.constant 0 : i32
    return %c0_i32, %c0_i32_0 : i32, i32
  }
  func.func @transform_3(%arg0: i32) -> (i32, i32) {
    %c0_i32 = arith.constant 0 : i32
    %c0_i32_0 = arith.constant 0 : i32
    %c0_i32_1 = arith.constant 0 : i32
    return %c0_i32, %c0_i32_0 : i32, i32
  }
  func.func @transform_4(%arg0: i32) -> (i32, i32) {
    %c0_i32 = arith.constant 0 : i32
    %c0_i32_0 = arith.constant 0 : i32
    %c0_i32_1 = arith.constant 0 : i32
    return %c0_i32, %c0_i32_0 : i32, i32
  }
  func.func @transform_5(%arg0: i32) -> (i32, i32) {
    %c0_i32 = arith.constant 0 : i32
    %c0_i32_0 = arith.constant 0 : i32
    %c0_i32_1 = arith.constant 0 : i32
    return %c0_i32, %c0_i32_0 : i32, i32
  }
  func.func @transform_6(%arg0: i32) -> (i32, i32) {
    %c0_i32 = arith.constant 0 : i32
    %c0_i32_0 = arith.constant 0 : i32
    return %arg0, %c0_i32 : i32, i32
  }
}

</mosaic_0001>

<bundles_post_ra>
// kernel: dann_forward.3
= control target key start
LH: loop header
LB: loop body
LE: loop exit
PB: predicated region body
PF: predicated region fallthrough
CT: control target
= control target key end

     0   :  { %vm121_vm0 = vcmask 15360   ;;  %s280_s1 = inlined_call_operand.vmem [shape: f32[128,128], index: 1, kind: input, shape index: {}]   ;;  %s281_s4 = inlined_call_operand.vmem [shape: f32[128,128], index: 4, kind: input, shape index: {}]   ;;  %s282_s2 = inlined_call_operand.vmem [shape: f32[1,128], index: 2, kind: input, shape index: {}]   ;;  %s283_s0 = inlined_call_operand.vmem [shape: f32[8,128], index: 0, kind: input, shape index: {}]   ;;  %s284_s3 = inlined_call_operand.vmem [shape: f32[1,128], index: 3, kind: input, shape index: {}]   ;;  %s285_s5 = inlined_call_operand.vmem [shape: f32[1,128], index: 5, kind: input, shape index: {}]   ;;  %s286_s6 = inlined_call_operand.vmem [shape: f32[8,2], index: 6, kind: output, shape index: {}]  }
   0x1   :  { %v39_v0 = vld [vmem:[%s280_s1 + $0x78] sm:$0xff]  ;;  %v38_v1 = vld [vmem:[%s280_s1 + $0x70] sm:$0xff]  ;;  %v37_v2 = vld [vmem:[%s280_s1 + $0x68] sm:$0xff] }
   0x2   :  { %40 = vmatpush.msra.mxu0 %v39_v0  ;;  %v36_v3 = vld [vmem:[%s280_s1 + $0x60] sm:$0xff]  ;;  %v86_v4 = vld [vmem:[%s281_s4 + $0x78] sm:$0xff]  ;;  %v85_v6 = vld [vmem:[%s281_s4 + $0x70] sm:$0xff] }
   0x3   :  { %v35_v5 = vld [vmem:[%s280_s1 + $0x58] sm:$0xff]  ;;  %91 = vmatpush.msra.mxu1 %v86_v4  ;;  %v84_v7 = vld [vmem:[%s281_s4 + $0x68] sm:$0xff]  ;;  %v34_v8 = vld [vmem:[%s280_s1 + $0x50] sm:$0xff] }
   0x4   :  { %41 = vmatpush.msra.mxu0 %v38_v1  ;;  %v83_v9 = vld [vmem:[%s281_s4 + $0x60] sm:$0xff]  ;;  %v33_v10 = vld [vmem:[%s280_s1 + $0x48] sm:$0xff]  ;;  %v82_v11 = vld [vmem:[%s281_s4 + $0x58] sm:$0xff] }
   0x5   :  { %92 = vmatpush.msra.mxu1 %v85_v6  ;;  %v32_v12 = vld [vmem:[%s280_s1 + $0x40] sm:$0xff]  ;;  %v81_v13 = vld [vmem:[%s281_s4 + $0x50] sm:$0xff]  ;;  %v31_v14 = vld [vmem:[%s280_s1 + $0x38] sm:$0xff] }
   0x6   :  { %42 = vmatpush.msra.mxu0 %v37_v2  ;;  %v80_v15 = vld [vmem:[%s281_s4 + $0x48] sm:$0xff]  ;;  %v30_v16 = vld [vmem:[%s280_s1 + $0x30] sm:$0xff]  ;;  %v79_v17 = vld [vmem:[%s281_s4 + $0x40] sm:$0xff] }
   0x7   :  { %93 = vmatpush.msra.mxu1 %v84_v7  ;;  %v29_v18 = vld [vmem:[%s280_s1 + $0x28] sm:$0xff]  ;;  %v78_v19 = vld [vmem:[%s281_s4 + $0x38] sm:$0xff]  ;;  %v28_v20 = vld [vmem:[%s280_s1 + $0x20] sm:$0xff] }
   0x8   :  { %43 = vmatpush.msra.mxu0 %v36_v3  ;;  %v77_v21 = vld [vmem:[%s281_s4 + $0x30] sm:$0xff]  ;;  %v27_v22 = vld [vmem:[%s280_s1 + $0x18] sm:$0xff]  ;;  %v76_v23 = vld [vmem:[%s281_s4 + $0x28] sm:$0xff] }
   0x9   :  { %94 = vmatpush.msra.mxu1 %v83_v9  ;;  %v26_v24 = vld [vmem:[%s280_s1 + $0x10] sm:$0xff]  ;;  %v75_v25 = vld [vmem:[%s281_s4 + $0x20] sm:$0xff]  ;;  %v25_v26 = vld [vmem:[%s280_s1 + $0x8] sm:$0xff] }
   0xa   :  { %44 = vmatpush.msra.mxu0 %v35_v5  ;;  %v24_v27 = vld [vmem:[%s280_s1] sm:$0xff]  ;;  %v74_v29 = vld [vmem:[%s281_s4 + $0x18] sm:$0xff]  ;;  %v73_v30 = vld [vmem:[%s281_s4 + $0x10] sm:$0xff] }
   0xb   :  { %95 = vmatpush.msra.mxu1 %v82_v11  ;;  %v23_v28 = vld [vmem:[%s283_s0] sm:$0xff]  ;;  %v72_v31 = vld [vmem:[%s281_s4 + $0x8] sm:$0xff] }
   0xc   :  { %45 = vmatpush.msra.mxu0 %v34_v8  ;;  %v71_v32 = vld [vmem:[%s281_s4] sm:$0xff] }
   0xd   :  { %96 = vmatpush.msra.mxu1 %v81_v13  ;;  %v127_v33 = vld [vmem:[%s282_s2] ss:$0 sm:$0xff] }
   0xe   :  { %46 = vmatpush.msra.mxu0 %v33_v10  ;;  %v128_v34 = vld [vmem:[%s284_s3] ss:$0 sm:$0xff] }
   0xf   :  { %97 = vmatpush.msra.mxu1 %v80_v15  ;;  %v129_v39 = vld [vmem:[%s285_s5] ss:$0 sm:$0xff] }
  0x10   :  { %47 = vmatpush.msra.mxu0 %v32_v12 }
  0x11   :  { %98 = vmatpush.msra.mxu1 %v79_v17 }
  0x12   :  { %48 = vmatpush.msra.mxu0 %v31_v14 }
  0x13   :  { %99 = vmatpush.msra.mxu1 %v78_v19 }
  0x14   :  { %49 = vmatpush.msra.mxu0 %v30_v16 }
  0x15   :  { %100 = vmatpush.msra.mxu1 %v77_v21 }
  0x16   :  { %50 = vmatpush.msra.mxu0 %v29_v18 }
  0x17   :  { %101 = vmatpush.msra.mxu1 %v76_v23 }
  0x18   :  { %51 = vmatpush.msra.mxu0 %v28_v20 }
  0x19   :  { %102 = vmatpush.msra.mxu1 %v75_v25 }
  0x1a   :  { %52 = vmatpush.msra.mxu0 %v27_v22 }
  0x1b   :  { %103 = vmatpush.msra.mxu1 %v74_v29 }
  0x1c   :  { %53 = vmatpush.msra.mxu0 %v26_v24 }
  0x1d   :  { %104 = vmatpush.msra.mxu1 %v73_v30 }
  0x1e   :  { %54 = vmatpush.msra.mxu0 %v25_v26 }
  0x1f   :  { %105 = vmatpush.msra.mxu1 %v72_v31 }
  0x20   :  { %55 = vmatpush.msra.mxu0 %v24_v27 }
  0x21   :  { %56 = vmatmul.f32.vlgmr.msra.gmra.mxu0 %v23_v28  ;;  %106 = vmatpush.msra.mxu1 %v71_v32 }
  0x9e   :  { %v57_v35 = vpop.f32.mrf.mxu0 }
  0x9f   :  { %v64_v36 = vmul.f32 %v127_v33, %v57_v35 }
  0xa1   :  { %v69_v37 = vadd.f32 %v128_v34, %v64_v36 }
  0xa3   :  { %v70_v38 = vmax.f32 %v69_v37, 0.0 }
  0xa5   :  { %107 = vmatmul.f32.vlgmr.msra.gmra.mxu1 %v70_v38 }
 0x122   :  { %v108_v40 = vpop.f32.mrf.mxu1 }
 0x123   :  { %v109_v41 = vadd.f32 %v129_v39, %v108_v40 }
 0x125   :  { %111 = vmax.xlane.f32.xlu0 %v109_v41 }
 0x198   :  { %v112_v42 = vpop.xlane.xlu0 %111 }
 0x199   :  { %v113_v43 = vsub.f32 %v109_v41, %v112_v42 }
 0x19b   :  { %v114_v44 = vmul.f32 1.442695, %v113_v43 }
 0x19d   :  { %130 = vpow2.f32 %v114_v44 }
 0x1a3   :  { %v131_v45 = vpop.eup %130 }
 0x1a4   :  { %116 = vadd.xlane.f32.xlu0 %v131_v45 }
 0x217   :  { %v117_v46 = vpop.xlane.xlu0 %116 }
 0x218   :  { %132 = vlog2.f32 %v117_v46 }
 0x21e   :  { %v133_v47 = vpop.eup %132 }
 0x21f   :  { %v119_v48 = vmul.f32 0.6931472, %v133_v47 }
 0x221   :  { %v120_v49 = vsub.f32 %v113_v43, %v119_v48 }
 0x223   :  { %122 = vst.msk [vmem:[%s286_s6] sm:$0xff] %vm121_vm0, %v120_v49 }

// kernel: dann_forward.2
= control target key start
LH: loop header
LB: loop body
LE: loop exit
PB: predicated region body
PF: predicated region fallthrough
CT: control target
= control target key end

     0   :  { %vm59_vm0 = vcmask 64512   ;;  %v117_v19 = vmov 1.0   ;;  %s195_s1 = inlined_call_operand.vmem [shape: f32[128,128], index: 1, kind: input, shape index: {}]   ;;  %s196_s0 = inlined_call_operand.vmem [shape: f32[8,128], index: 0, kind: input, shape index: {}]   ;;  %s197_s2 = inlined_call_operand.vmem [shape: f32[1,1,128], index: 2, kind: output, shape index: {0}]   ;;  %s198_s3 = inlined_call_operand.vmem [shape: f32[1,1,128], index: 3, kind: output, shape index: {1}]  }
   0x1   :  { %v29_v0 = vld [vmem:[%s195_s1 + $0x78] sm:$0xff]  ;;  %v28_v1 = vld [vmem:[%s195_s1 + $0x70] sm:$0xff]  ;;  %v27_v2 = vld [vmem:[%s195_s1 + $0x68] sm:$0xff] }
   0x2   :  { %30 = vmatpush.msra.mxu0 %v29_v0  ;;  %v26_v3 = vld [vmem:[%s195_s1 + $0x60] sm:$0xff]  ;;  %v25_v4 = vld [vmem:[%s195_s1 + $0x58] sm:$0xff]  ;;  %v24_v5 = vld [vmem:[%s195_s1 + $0x50] sm:$0xff] }
   0x3   :  { %v23_v6 = vld [vmem:[%s195_s1 + $0x48] sm:$0xff]  ;;  %v22_v7 = vld [vmem:[%s195_s1 + $0x40] sm:$0xff]  ;;  %v21_v8 = vld [vmem:[%s195_s1 + $0x38] sm:$0xff] }
   0x4   :  { %31 = vmatpush.msra.mxu0 %v28_v1  ;;  %v20_v9 = vld [vmem:[%s195_s1 + $0x30] sm:$0xff]  ;;  %v19_v10 = vld [vmem:[%s195_s1 + $0x28] sm:$0xff]  ;;  %v18_v11 = vld [vmem:[%s195_s1 + $0x20] sm:$0xff] }
   0x5   :  { %v17_v12 = vld [vmem:[%s195_s1 + $0x18] sm:$0xff]  ;;  %v16_v13 = vld [vmem:[%s195_s1 + $0x10] sm:$0xff]  ;;  %v15_v14 = vld [vmem:[%s195_s1 + $0x8] sm:$0xff] }
   0x6   :  { %32 = vmatpush.msra.mxu0 %v27_v2  ;;  %v14_v15 = vld [vmem:[%s195_s1] sm:$0xff] }
   0x7   :  { %v13_v16 = vld [vmem:[%s196_s0] sm:$0xff] }
   0x8   :  { %33 = vmatpush.msra.mxu0 %v26_v3 }
   0xa   :  { %34 = vmatpush.msra.mxu0 %v25_v4 }
   0xc   :  { %35 = vmatpush.msra.mxu0 %v24_v5 }
   0xe   :  { %36 = vmatpush.msra.mxu0 %v23_v6 }
  0x10   :  { %37 = vmatpush.msra.mxu0 %v22_v7 }
  0x12   :  { %38 = vmatpush.msra.mxu0 %v21_v8 }
  0x14   :  { %39 = vmatpush.msra.mxu0 %v20_v9 }
  0x16   :  { %40 = vmatpush.msra.mxu0 %v19_v10 }
  0x18   :  { %41 = vmatpush.msra.mxu0 %v18_v11 }
  0x1a   :  { %42 = vmatpush.msra.mxu0 %v17_v12 }
  0x1c   :  { %43 = vmatpush.msra.mxu0 %v16_v13 }
  0x1e   :  { %44 = vmatpush.msra.mxu0 %v15_v14 }
  0x20   :  { %45 = vmatpush.msra.mxu0 %v14_v15 }
  0x21   :  { %46 = vmatmul.f32.vlgmr.msra.gmra.mxu0 %v13_v16 }
  0x9e   :  { %v47_v17 = vpop.f32.mrf.mxu0 }
  0x9f   :  { %78 = vmatpush.msra.mxu1 %v47_v17  ;;  %v84_v18 = vmul.f32 %v47_v17, %v47_v17 }
  0xa0   :  { %114 = vmatmul.msk.f32.vlgmr.msra.gmra.mxu1 %vm59_vm0, %v117_v19 }
  0xa1   :  { %100 = vmatpush.msra.mxu2 %v84_v18 }
  0xa2   :  { %115 = vmatmul.msk.f32.vlgmr.msra.gmra.mxu2 %vm59_vm0, %v117_v19 }
 0x11d   :  { %v80_v20 = vpop.f32.mrf.mxu1 }
 0x11e   :  { %83 = vst [vmem:[%s197_s2] sm:$0x1] %v80_v20 }
 0x125   :  { %v102_v21 = vpop.f32.mrf.mxu2 }
 0x126   :  { %105 = vst [vmem:[%s198_s3] sm:$0x1] %v102_v21 }

</bundles_post_ra>
